<compile_context>
chip_gen: v7x
topology: tpu7x:2x2x1
jax: 0.10.0
libtpu: 0.0.40
codegen_flags: <defaults>
</compile_context>

<pallas_src>
import functools

import jax
import jax.numpy as jnp
from jax.experimental import pallas as pl
from jax.experimental.pallas import tpu as pltpu


def _scale_loss_kernel(loss_ref, out_ref, *, inv_steps):
    # Scalar hot path (SMEM -> SMEM): out = loss * (1 / grad_accum_steps)
    out_ref[0, 0] = loss_ref[0, 0] * inv_steps


class LossFunction:
    """JAX/Pallas equivalent of the PyTorch LossFunction module."""

    def __init__(self, gradient_accumulation_steps: int):
        self.gradient_accumulation_steps = int(gradient_accumulation_steps)

    def __call__(self, pred_loss, b_label=None):
        # b_label is unused, exactly as in the PyTorch reference.

        # Short-circuit: steps <= 1 is a pure pass-through (no kernel, no
        # reshape, no cast) -- matches `loss = pred_loss`.
        if self.gradient_accumulation_steps <= 1:
            return pred_loss

        x = jnp.asarray(pred_loss)
        orig_shape = x.shape
        orig_dtype = x.dtype

        # The upstream loss is a scalar; present it as a (1, 1) SMEM value.
        # (SMEM works on 32-bit words, so sub-f32 inputs are widened to f32.)
        # TODO(synk): non-scalar pred_loss would need an elementwise VMEM path.
        needs_cast = orig_dtype != jnp.float32
        x32 = (x.astype(jnp.float32) if needs_cast else x).reshape(1, 1)

        inv_steps = 1.0 / float(self.gradient_accumulation_steps)
        kernel = functools.partial(_scale_loss_kernel, inv_steps=inv_steps)

        out = pl.pallas_call(
            kernel,
            out_shape=jax.ShapeDtypeStruct((1, 1), jnp.float32),
            in_specs=[pl.BlockSpec(memory_space=pltpu.MemorySpace.SMEM)],
            out_specs=pl.BlockSpec(memory_space=pltpu.MemorySpace.SMEM),
        )(x32)

        out = out.reshape(orig_shape)
        if needs_cast:
            out = out.astype(orig_dtype)
        return out


if __name__ == "__main__":
    key = jax.random.PRNGKey(0)
    k_loss, k_label = jax.random.split(key)

    # Small shapes consistent with the module: a scalar loss coming out of a
    # token-classification head, and integer labels of shape (batch=2, seq=8).
    pred_loss = jnp.abs(jax.random.normal(k_loss, (), dtype=jnp.float32))
    b_label = jax.random.randint(k_label, (2, 8), 0, 10, dtype=jnp.int32)

    # Case 1: gradient_accumulation_steps > 1 -> loss is divided.
    loss_fn = LossFunction(gradient_accumulation_steps=4)
    out = loss_fn(pred_loss, b_label)
    jax.block_until_ready(out)
    expected = pred_loss / 4.0
    assert jnp.allclose(out, expected, rtol=1e-6, atol=1e-6), (out, expected)

    # Case 2: gradient_accumulation_steps == 1 -> pass-through (no kernel).
    loss_fn_1 = LossFunction(gradient_accumulation_steps=1)
    out1 = loss_fn_1(pred_loss, b_label)
    jax.block_until_ready(out1)
    assert jnp.allclose(out1, pred_loss, rtol=1e-6, atol=1e-6), (out1, pred_loss)

    print("KERNEL_OK")
</pallas_src>

<mosaic_0001>
module attributes {stable_mosaic.version = 11 : i64} {
  func.func @_scale_loss_kernel(%arg0: memref<1x1xf32, #tpu.memory_space<smem>>, %arg1: memref<1x1xf32, #tpu.memory_space<smem>>) attributes {dimension_semantics = [], scalar_prefetch = 0 : i64, scratch_operands = 0 : i64, tpu.core_type = #tpu.core_type<tc>} {
    %c0 = arith.constant 0 : index
    %c0_0 = arith.constant 0 : index
    %0 = memref.load %arg0[%c0, %c0_0] : memref<1x1xf32, #tpu.memory_space<smem>>
    %cst = arith.constant 2.500000e-01 : f32
    %1 = arith.mulf %0, %cst : f32
    %c0_1 = arith.constant 0 : index
    %c0_2 = arith.constant 0 : index
    %2 = memref.load %arg1[%c0_1, %c0_2] : memref<1x1xf32, #tpu.memory_space<smem>>
    memref.store %1, %arg1[%c0_1, %c0_2] : memref<1x1xf32, #tpu.memory_space<smem>>
    return
  }
}

</mosaic_0001>

<bundles_post_ra>
// kernel: tpu_custom_call.1
= control target key start
LH: loop header
LB: loop body
LE: loop exit
PB: predicated region body
PF: predicated region fallthrough
CT: control target
= control target key end

     0   :  { %7 = vsyncpa [#allocation4], 0  ;;  %s66_s0 = inlined_call_operand.<no memory space> [shape: f32[1,1], index: 0, kind: input, shape index: {}]   ;;  %s67_s1 = inlined_call_operand.hbm [shape: f32[1,1], index: 1, kind: output, shape index: {}]  }
   0x1   :  { %s11_s8 = smul.f32 0.25, %s66_s0  ;;  %s28_s11 = scalar_lea.hbm %s67_s1, 16 }
   0x2   :  { %p29_p0 = scmp.ne.s32.totalorder %s67_s1, %s28_s11  ;;  %p32_p1 = scmp.lt.u32.totalorder %s28_s11, %s67_s1 }
   0x3   :  { %13 = sst [smem:[#allocation3]] %s11_s8 }
   0x4   :  { %p34_p2 = pnand %p32_p1, %p29_p0 }
   0x6   :  { %37 = shalt.err (!%p34_p2)
}
   0x7   :  { %s40_s16 = smov [#allocation3]  }
   0x8   :  { %21 = dma.smem_to_hbm %s40_s16, 16, %s67_s1, [#allocation4]  }
   0x9   :  { %38 = dma.done.wait [#allocation4], 16  }
   0xa   :  { %39 = vsyncadd [#allocation4], 4294967280 }
   0xb   :  { %25 = sfence }
   0xc   :  { %26 = vsyncpa [#allocation4], 1 }

</bundles_post_ra>
